<compile_context>
chip_gen: v6e
topology: v6e:2x2x1
jax: 0.10.0
libtpu: 0.0.40
codegen_flags: <defaults>
</compile_context>

<pallas_src>
import jax
import jax.numpy as jnp
from jax.experimental import pallas as pl
from jax.experimental.pallas import tpu as pltpu


def _prompt_gather_kernel(idx_ref, table_ref, out_ref):
    # idx_ref:   VMEM (sp_len, 1) int32  -- gather indices (same for every hidden tile)
    # table_ref: VMEM (n_rows, tile_h)   -- soft-prompt table, current hidden tile
    # out_ref:   VMEM (sp_len, tile_h)   -- gathered rows, current hidden tile
    sp_len = out_ref.shape[0]
    n_rows = table_ref.shape[0]

    # Clamp data-dependent indices so an OOB index cannot read past the table.
    idx = jnp.clip(idx_ref[...], 0, n_rows - 1)                      # (sp_len, 1)

    # One-hot selection matrix on the VPU, gather via one MXU push.
    row_ids = jax.lax.broadcasted_iota(jnp.int32, (sp_len, n_rows), 1)
    one_hot = (row_ids == idx).astype(table_ref.dtype)               # (sp_len, n_rows)
    gathered = jnp.dot(one_hot, table_ref[...],
                       preferred_element_type=jnp.float32)           # (sp_len, tile_h)

    # Single dense, unmasked slab store.
    out_ref[...] = gathered.astype(out_ref.dtype)


def prompt_encoder_forward(soft_prompt: jax.Array, seq_indices: jax.Array) -> jax.Array:
    """Embedding lookup: returns soft_prompt[seq_indices] of shape (sp_len, hidden)."""
    sp_len = seq_indices.shape[0]
    n_rows, hidden = soft_prompt.shape
    idx = seq_indices.astype(jnp.int32).reshape(sp_len, 1)

    # Tile the hidden (lane) axis so a single block never blows VMEM at large
    # hidden; at hidden<=2048 this is a single full-extent block (grid of 1).
    if hidden % 128 == 0:
        tile_h = min(hidden, 2048)
    else:
        tile_h = hidden                      # full-extent block (always legal)
    grid = (pl.cdiv(hidden, tile_h),)

    itemsize = jnp.dtype(soft_prompt.dtype).itemsize
    cost = pl.CostEstimate(
        flops=2 * sp_len * n_rows * hidden,
        transcendentals=0,
        bytes_accessed=(n_rows * hidden + sp_len * hidden) * itemsize + sp_len * 4,
    )

    return pl.pallas_call(
        _prompt_gather_kernel,
        out_shape=jax.ShapeDtypeStruct((sp_len, hidden), soft_prompt.dtype),
        grid_spec=pl.GridSpec(
            grid=grid,
            in_specs=[
                # Indices: tiny full-extent block, same for every hidden tile.
                pl.BlockSpec((sp_len, 1), lambda j: (0, 0)),
                # Table: all rows, current hidden tile.
                pl.BlockSpec((n_rows, tile_h), lambda j: (0, j)),
            ],
            # Output: all prompt rows, current hidden tile (lane-dense slab).
            out_specs=pl.BlockSpec((sp_len, tile_h), lambda j: (0, j)),
        ),
        compiler_params=pltpu.CompilerParams(
            dimension_semantics=("parallel",),   # v7x: 2 TCs split the lane tiles
        ),
        cost_estimate=cost,
    )(idx, soft_prompt)


def build_prompt_encoder_params(key, vocab_size: int, hidden: int, sp_len: int):
    """Mirrors PromptEncoder.random_init with args.prompt_init == 'random'."""
    # Frozen backbone embedding table (stand-in for the `embeddings` arg).
    emb_table = 0.02 * jax.random.normal(key, (vocab_size, hidden), dtype=jnp.float32)
    # init_tokens = arange(1000, 1000 + sp_len); soft_prompt = embeddings(init_tokens)
    init_tokens = jnp.arange(1000, 1000 + sp_len, dtype=jnp.int32)
    soft_prompt = jnp.take(emb_table, init_tokens, axis=0)           # (sp_len, hidden)
    # self.seq_indices = arange(sp_len)
    seq_indices = jnp.arange(sp_len, dtype=jnp.int32)
    return soft_prompt, seq_indices


if __name__ == "__main__":
    # Small, module-consistent shapes: sp_len (soft prompt length) = 8, hidden = 128.
    VOCAB, HIDDEN, SP_LEN = 1024, 128, 8

    key = jax.random.PRNGKey(0)
    soft_prompt, seq_indices = build_prompt_encoder_params(key, VOCAB, HIDDEN, SP_LEN)

    out = prompt_encoder_forward(soft_prompt, seq_indices)
    out = jax.block_until_ready(out)

    # Reference: plain JAX embedding lookup (== torch.nn.Embedding forward).
    ref = jnp.take(soft_prompt, seq_indices, axis=0)
    assert out.shape == (SP_LEN, HIDDEN) and out.dtype == jnp.float32
    assert jnp.allclose(out, ref), "Pallas gather does not match reference lookup"

    # Also exercise a non-arange index pattern to confirm gather generality.
    perm = jnp.flip(seq_indices)
    out_perm = jax.block_until_ready(prompt_encoder_forward(soft_prompt, perm))
    assert jnp.allclose(out_perm, jnp.take(soft_prompt, perm, axis=0))

    # TODO(synk): the rest of PromptTune (HF backbone forward/generate, tokenizer,
    # trie-constrained decoding, cross-entropy losses) has no Pallas equivalent
    # here; only the soft-prompt embedding lookup is implemented as a kernel.
    print("KERNEL_OK")
</pallas_src>

<mosaic_0001>
module attributes {stable_mosaic.version = 11 : i64} {
  func.func @_prompt_gather_kernel(%arg0: i32, %arg1: memref<8x1xi32, #tpu.memory_space<vmem>>, %arg2: memref<8x128xf32, #tpu.memory_space<vmem>>, %arg3: memref<8x128xf32, #tpu.memory_space<vmem>>) attributes {dimension_semantics = [#tpu.dimension_semantics<parallel>], iteration_bounds = array<i64: 1>, scalar_prefetch = 0 : i64, scratch_operands = 0 : i64, tpu.core_type = #tpu.core_type<tc>, window_params = [{pipeline_mode = #tpu.pipeline_mode<synchronous>, transform_indices = @transform_0, window_bounds = array<i64: 8, 1>}, {transform_indices = @transform_1, window_bounds = array<i64: 8, 128>}, {transform_indices = @transform_2, window_bounds = array<i64: 8, 128>}]} {
    %c0 = arith.constant 0 : index
    %c0_0 = arith.constant 0 : index
    %0 = vector.load %arg1[%c0, %c0_0] : memref<8x1xi32, #tpu.memory_space<vmem>>, vector<8x1xi32>
    %c0_i32 = arith.constant 0 : i32
    %c7_i32 = arith.constant 7 : i32
    %1 = vector.broadcast %c0_i32 : i32 to vector<8x1xi32>
    %2 = arith.maxsi %1, %0 : vector<8x1xi32>
    %3 = vector.broadcast %c7_i32 : i32 to vector<8x1xi32>
    %4 = arith.minsi %3, %2 : vector<8x1xi32>
    %5 = tpu.iota {dimensions = array<i32: 1>} : vector<8x8xi32>
    %6 = vector.broadcast %4 : vector<8x1xi32> to vector<8x8xi32>
    %7 = arith.cmpi eq, %5, %6 : vector<8x8xi32>
    %8 = arith.extui %7 : vector<8x8xi1> to vector<8x8xi32>
    %9 = arith.sitofp %8 : vector<8x8xi32> to vector<8x8xf32>
    %c0_1 = arith.constant 0 : index
    %c0_2 = arith.constant 0 : index
    %10 = vector.load %arg2[%c0_1, %c0_2] : memref<8x128xf32, #tpu.memory_space<vmem>>, vector<8x128xf32>
    %cst = arith.constant dense<0.000000e+00> : vector<8x128xf32>
    %11 = tpu.matmul %9, %10, %cst {dimension_numbers = #tpu.dot_dimension_numbers<[1], [0], [0], [1], [0, 0, 1, 1], [], []>} : vector<8x8xf32>, vector<8x128xf32>, vector<8x128xf32> -> vector<8x128xf32>
    %c0_3 = arith.constant 0 : index
    %c0_4 = arith.constant 0 : index
    %12 = vector.load %arg3[%c0_3, %c0_4] : memref<8x128xf32, #tpu.memory_space<vmem>>, vector<8x128xf32>
    tpu.vector_store %arg3[%c0_3, %c0_4], %11 {strides = array<i32>} : memref<8x128xf32, #tpu.memory_space<vmem>>, vector<8x128xf32>,
    return
  }
  func.func @transform_0(%arg0: i32) -> (i32, i32) {
    %c0_i32 = arith.constant 0 : i32
    %c0_i32_0 = arith.constant 0 : i32
    %c0_i32_1 = arith.constant 0 : i32
    return %c0_i32, %c0_i32_0 : i32, i32
  }
  func.func @transform_1(%arg0: i32) -> (i32, i32) {
    %c0_i32 = arith.constant 0 : i32
    %c0_i32_0 = arith.constant 0 : i32
    return %c0_i32, %arg0 : i32, i32
  }
  func.func @transform_2(%arg0: i32) -> (i32, i32) {
    %c0_i32 = arith.constant 0 : i32
    %c0_i32_0 = arith.constant 0 : i32
    return %c0_i32, %arg0 : i32, i32
  }
}

</mosaic_0001>

<bundles_post_ra>
// kernel: tpu_custom_call.1
= control target key start
LH: loop header
LB: loop body
LE: loop exit
PB: predicated region body
PF: predicated region fallthrough
CT: control target
= control target key end

     0   :  { %s179_s0 = inlined_call_operand.vmem [shape: s32[8,1], index: 0, kind: input, shape index: {}]   ;;  %s180_s1 = inlined_call_operand.vmem [shape: f32[8,128], index: 1, kind: input, shape index: {}]   ;;  %s181_s2 = inlined_call_operand.hbm [shape: f32[8,128], index: 2, kind: output, shape index: {}]  }
   0x1   :  { %v12_v0 = vld [vmem:[%s179_s0] sm:$0xff] }
   0x2   :  { %7 = vsyncpa [#allocation3], 0  ;;  %v151_v1 = vmov 0   ;;  %vm13_vm0 = vcmp.gt.s32.totalorder %v12_v0, 0  ;;  %v152_v2 = vmov 0.0   ;;  %v25_v3 = vld [vmem:[%s180_s1] sm:$0xff]  ;;  %v17_v6 = vlaneseq }
   0x3   :  { %128 = vset.pattern.permute.xlu0 %v151_v1  ;;  %119 = vmatprep.subr.mxu0 %v152_v2  ;;  %v14_v4 = vsel %vm13_vm0, %v12_v0, 0  ;;  %vm153_vm1 = vmmov 0   ;;  %vm26_vm3 = vcmask 64512   ;;  %s154_s0 = smov [#allocation2]  }
   0x4   :  { %120 = vmatpush3.msra.mxu0 %v25_v3  ;;  %121 = vmatprep.mubr.msk.f32.mxu0 %vm153_vm1, %v152_v2  ;;  %vm15_vm2 = vcmp.lt.s32.totalorder %v14_v4, 7  ;;  %v18_v7 = vand.u32 127, %v17_v6  ;;  %s107_s13 = sshll.u32 %s154_s0, 4  ;;  %s108_s13 = int_to_ptr.vmem [resolvable:$true] %s107_s13 }
   0x5   :  { %v16_v5 = vsel %vm15_vm2, %v14_v4, 7  ;;  %s129_s1 = scalar_lea.vmem %s108_s13, 128  ;;  %p134_p1 = scmp.lt.s32.totalorder %s108_s13, %s108_s13 }
   0x6   :  { %20 = vperm.xlu0 %128, %v16_v5   ;;  %p130_p0 = scmp.ne.s32.totalorder %s108_s13, %s129_s1  ;;  %p135_p2 = scmp.lt.s32.totalorder %s129_s1, %s129_s1 }
   0x8   :  { %p136_p3 = por %p135_p2, %p134_p1 }
   0xa   :  { %p137_p4 = pnand %p136_p3, %p130_p0 }
  0x81   :  { %v21_v8 = vpop.permute.xlu0 %20 }
  0x82   :  { %vm22_vm4 = vcmp.eq.s32.totalorder %v18_v7, %v21_v8 }
  0x83   :  { %v115_v9 = vsel %vm22_vm4, 1.0, %v152_v2 }
  0x84   :  { %122 = vmatmul.mubr.msk.f32.vlgmr.msra.gmra.mxu0 %vm26_vm3, %v115_v9 }
 0x144   :  { %v96_v10 = vpop.f32.mrf.mxu0 }
 0x145   :  { %100 = vst [vmem:[#allocation2] sm:$0xff] %v96_v10 }
 0x146   :  { %v123_v11 = vpop.f32.mrf.mxu0 }
 0x147   :  { %140 = shalt.err (!%p137_p4)
}
 0x148   :  { %110 = dma.vmem_to_hbm [thread:$0]  %s108_s13, 128, %s181_s2, [#allocation3]  }
 0x149   :  { %149 = dma.done.wait [#allocation3], 128  }
 0x14a   :  { %150 = vsyncadd [#allocation3], 4294967168 }
 0x14b   :  { %114 = vsyncpa [#allocation3], 1 }

</bundles_post_ra>
